<compile_context>
chip_gen: v7x
topology: tpu7x:2x2x1
jax: 0.10.0
libtpu: 0.0.40
codegen_flags: <defaults>
</compile_context>

<pallas_src>
import numpy as np

import jax
import jax.numpy as jnp
from jax.experimental import pallas as pl
from jax.experimental.pallas import tpu as pltpu


def _round_up(x, m):
    return ((x + m - 1) // m) * m


def _lane(n):
    return _round_up(n, 128)


def _split_hi_lo_bf16(w):
    """w (f32) ~= hi + lo with hi, lo bf16; residual error ~ |w| * 2^-16."""
    hi = w.astype(jnp.bfloat16)
    lo = (w - hi.astype(jnp.float32)).astype(jnp.bfloat16)
    return hi, lo


def _num_tensorcores_per_chip():
    """2 TensorCores/chip on v4 / v5p megacore and TPU7x; 1 on v5e / v6e."""
    try:
        kind = jax.devices()[0].device_kind.lower()
    except Exception:
        return 1
    if ("v4" in kind) or ("v5p" in kind) or ("7" in kind):
        return 2
    return 1


def atom_encoder_kernel(at_ref, rf_ref, pf_ref,
                        wa_hi_ref, wa_lo_ref,
                        wfr_hi_ref, wfr_lo_ref,
                        wfp_hi_ref, wfp_lo_ref,
                        b_ref, out_ref):
    # One-hot inputs are exactly representable in bf16; cast is a no-op for
    # bf16 inputs and a cheap VPU pass otherwise.
    at = at_ref[...].astype(jnp.bfloat16)   # (tile_p, pack * num_atom_type)
    rf = rf_ref[...].astype(jnp.bfloat16)   # (tile_p, pack * feat_dim)
    pf = pf_ref[...].astype(jnp.bfloat16)   # (tile_p, pack * feat_dim)

    # z = at @ [Wa|0] + rf @ [Wf|-Wf] + pf @ [0|Wf] + [b_a+b_f | 0]
    # Each fused weight is bf16 hi + bf16 lo; all accumulation in f32.
    z = jnp.dot(at, wa_hi_ref[...], preferred_element_type=jnp.float32)
    z += jnp.dot(at, wa_lo_ref[...], preferred_element_type=jnp.float32)
    z += jnp.dot(rf, wfr_hi_ref[...], preferred_element_type=jnp.float32)
    z += jnp.dot(rf, wfr_lo_ref[...], preferred_element_type=jnp.float32)
    z += jnp.dot(pf, wfp_hi_ref[...], preferred_element_type=jnp.float32)
    z += jnp.dot(pf, wfp_lo_ref[...], preferred_element_type=jnp.float32)
    z += b_ref[...]
    out_ref[...] = z.astype(out_ref.dtype)


def make_atom_encoder(w_atom, b_atom, w_feat, b_feat, *,
                      tile_n=16384, out_dtype=jnp.float32,
                      num_tensorcores=None,
                      vmem_data_budget=28 * 1024 * 1024):
    """Build a jitted AtomEncoder forward with fused weights precomputed once."""
    num_atom_type, h2 = w_atom.shape
    feat_dim = w_feat.shape[0]
    hidden = 2 * h2

    # Lane-pack factor: pack atoms per packed row so the output block is
    # pack*hidden >= 128 lanes wide (unmasked stores).
    pack = 128 // hidden if (hidden <= 128 and 128 % hidden == 0) else 1

    if num_tensorcores is None:
        num_tensorcores = _num_tensorcores_per_chip()

    # ---- one-time weight fusion (hoisted out of the per-call path) ----
    f32 = jnp.float32
    w_atom_f = jnp.asarray(w_atom, f32)
    w_feat_f = jnp.asarray(w_feat, f32)
    b_atom_f = jnp.asarray(b_atom, f32)
    b_feat_f = jnp.asarray(b_feat, f32)

    zeros_a = jnp.zeros((num_atom_type, h2), f32)
    zeros_f = jnp.zeros((feat_dim, h2), f32)
    eye_p = jnp.eye(pack, dtype=f32)
    wa_blk = jnp.kron(eye_p, jnp.concatenate([w_atom_f, zeros_a], axis=1))
    wfr_blk = jnp.kron(eye_p, jnp.concatenate([w_feat_f, -w_feat_f], axis=1))
    wfp_blk = jnp.kron(eye_p, jnp.concatenate([zeros_f, w_feat_f], axis=1))
    bias_blk = jnp.tile(
        jnp.concatenate([b_atom_f + b_feat_f, jnp.zeros((h2,), f32)]), pack
    ).reshape(1, pack * hidden)

    wa_hi, wa_lo = _split_hi_lo_bf16(wa_blk)
    wfr_hi, wfr_lo = _split_hi_lo_bf16(wfr_blk)
    wfp_hi, wfp_lo = _split_hi_lo_bf16(wfp_blk)

    # ---- static VMEM accounting (bytes) used to cap the row tile ----
    out_itemsize = np.dtype(out_dtype).itemsize
    in_row_bytes = (_lane(pack * num_atom_type) + 2 * _lane(pack * feat_dim)) * 2  # bf16
    out_row_bytes = _lane(pack * hidden) * out_itemsize
    per_packed_row = 2 * (in_row_bytes + out_row_bytes)          # double-buffered
    w_rows = pack * (num_atom_type + 2 * feat_dim)
    weight_bytes = 2 * 2 * _round_up(w_rows, 16) * _lane(pack * hidden) * 2  # hi+lo, 2 bufs
    weight_bytes += 2 * _lane(pack * hidden) * 4                  # bias

    budget_rows = max(
        8, (max(vmem_data_budget - weight_bytes, 0) // per_packed_row) // 8 * 8)
    desired_tile_p = max(8, _round_up(max(tile_n, 8 * pack) // pack, 8))
    base_tile_p = min(desired_tile_p, budget_rows)

    def forward(atom_type, r_feat, p_feat):
        natoms = atom_type.shape[0]
        assert atom_type.shape[1] == num_atom_type
        assert r_feat.shape == (natoms, feat_dim)
        assert p_feat.shape == (natoms, feat_dim)

        # Pad rows only to a multiple of `pack` (<= pack-1 rows) so the
        # lane-pack reshape is valid.  No pad to a multiple of the tile:
        # the ragged last grid block is masked by Pallas.
        pad = (-natoms) % pack
        if pad:
            atom_type_ = jnp.pad(atom_type, ((0, pad), (0, 0)))
            r_feat_ = jnp.pad(r_feat, ((0, pad), (0, 0)))
            p_feat_ = jnp.pad(p_feat, ((0, pad), (0, 0)))
        else:
            atom_type_, r_feat_, p_feat_ = atom_type, r_feat, p_feat
        rows = (natoms + pad) // pack

        # Lane-pack: (rows*pack, d) -> (rows, pack*d); pure row-major reshape.
        at_p = atom_type_.reshape(rows, pack * num_atom_type)
        rf_p = r_feat_.reshape(rows, pack * feat_dim)
        pf_p = p_feat_.reshape(rows, pack * feat_dim)

        # Row-tile sizing: big, VMEM-capped, never (much) larger than input.
        tile_p = min(base_tile_p, _round_up(rows, 8))
        grid_len = pl.cdiv(rows, tile_p)
        # 2-TensorCore chips (v7x / megacore): make the grid divisible by the
        # core count so both cores get equal work.  Skip on 1-TC chips.
        if (num_tensorcores > 1 and rows > 8 * num_tensorcores
                and grid_len % num_tensorcores != 0):
            g = _round_up(grid_len, num_tensorcores)
            tile_p = max(8, _round_up(pl.cdiv(rows, g), 8))
            grid_len = pl.cdiv(rows, tile_p)

        vmem_limit = int(min(
            64 * 1024 * 1024,                     # legal on v7x's 64 MiB/TC
            max(32 * 1024 * 1024,
                tile_p * per_packed_row + weight_bytes + 8 * 1024 * 1024),
        ))

        out_p = pl.pallas_call(
            atom_encoder_kernel,
            out_shape=jax.ShapeDtypeStruct((rows, pack * hidden), out_dtype),
            grid_spec=pltpu.PrefetchScalarGridSpec(
                num_scalar_prefetch=0,
                grid=(grid_len,),
                in_specs=[
                    pl.BlockSpec((tile_p, pack * num_atom_type), lambda i: (i, 0)),
                    pl.BlockSpec((tile_p, pack * feat_dim), lambda i: (i, 0)),
                    pl.BlockSpec((tile_p, pack * feat_dim), lambda i: (i, 0)),
                    pl.BlockSpec((pack * num_atom_type, pack * hidden), lambda i: (0, 0)),
                    pl.BlockSpec((pack * num_atom_type, pack * hidden), lambda i: (0, 0)),
                    pl.BlockSpec((pack * feat_dim, pack * hidden), lambda i: (0, 0)),
                    pl.BlockSpec((pack * feat_dim, pack * hidden), lambda i: (0, 0)),
                    pl.BlockSpec((pack * feat_dim, pack * hidden), lambda i: (0, 0)),
                    pl.BlockSpec((pack * feat_dim, pack * hidden), lambda i: (0, 0)),
                    pl.BlockSpec((1, pack * hidden), lambda i: (0, 0)),
                ],
                out_specs=pl.BlockSpec((tile_p, pack * hidden), lambda i: (i, 0)),
            ),
            compiler_params=pltpu.CompilerParams(
                dimension_semantics=("parallel",),
                vmem_limit_bytes=vmem_limit),
        )(at_p, rf_p, pf_p,
          wa_hi, wa_lo, wfr_hi, wfr_lo, wfp_hi, wfp_lo, bias_blk)

        # Unpack lanes back to (natoms, hidden); drop the <= pack-1 pad rows.
        return out_p.reshape(rows * pack, hidden)[:natoms]

    return jax.jit(forward)


def reference_forward(atom_type, r_feat, p_feat, w_atom, b_atom, w_feat, b_feat):
    atom_emb = atom_type.astype(jnp.float32) @ w_atom + b_atom
    r_emb = r_feat.astype(jnp.float32) @ w_feat + b_feat
    p_emb = p_feat.astype(jnp.float32) @ w_feat + b_feat
    return jnp.concatenate([atom_emb + r_emb, p_emb - r_emb], axis=-1)


if __name__ == "__main__":
    # config: num_atom_type=8, num_atom_feat=4 (-> feat dim 40), hidden_dim=32
    num_atom_type = 8
    num_atom_feat = 4
    feat_dim = num_atom_feat * 10
    hidden_dim = 32
    h2 = hidden_dim // 2

    key = jax.random.PRNGKey(0)
    k4, k5, k6, k7 = jax.random.split(key, 4)

    # Linear params: weight (in, out), bias (out,)
    w_atom = jax.random.normal(k4, (num_atom_type, h2), jnp.float32) * 0.1
    b_atom = jax.random.normal(k5, (h2,), jnp.float32) * 0.01
    w_feat = jax.random.normal(k6, (feat_dim, h2), jnp.float32) * 0.1
    b_feat = jax.random.normal(k7, (h2,), jnp.float32) * 0.01

    # Default (large-tile) encoder + a small-tile encoder that exercises a
    # multi-step grid, the ragged last block, and the pack-row padding path.
    enc_default = make_atom_encoder(w_atom, b_atom, w_feat, b_feat)
    enc_small = make_atom_encoder(w_atom, b_atom, w_feat, b_feat, tile_n=2048)

    for natoms, enc in ((256, enc_default), (200, enc_default), (4998, enc_small)):
        ka, kb, kc = jax.random.split(jax.random.fold_in(key, natoms), 3)
        atom_ids = jax.random.randint(ka, (natoms,), 0, num_atom_type)
        atom_type = jax.nn.one_hot(atom_ids, num_atom_type, dtype=jnp.bfloat16)
        r_ids = jax.random.randint(kb, (natoms,), 0, feat_dim)
        r_feat = jax.nn.one_hot(r_ids, feat_dim, dtype=jnp.bfloat16)
        p_ids = jax.random.randint(kc, (natoms,), 0, feat_dim)
        p_feat = jax.nn.one_hot(p_ids, feat_dim, dtype=jnp.bfloat16)

        out = jax.block_until_ready(enc(atom_type, r_feat, p_feat))
        ref = reference_forward(atom_type, r_feat, p_feat,
                                w_atom, b_atom, w_feat, b_feat)
        assert out.shape == (natoms, hidden_dim)
        # bf16 hi/lo weight split keeps |err| <~ 2 * |w| * 2^-16 (~1e-5 here).
        err = float(jnp.max(jnp.abs(out - ref)))
        assert jnp.allclose(out, ref, atol=3e-5, rtol=1e-5), err

    print("KERNEL_OK")
</pallas_src>

<mosaic_0001>
module attributes {stable_mosaic.version = 11 : i64} {
  func.func @atom_encoder_kernel(%arg0: i32, %arg1: memref<64x32xbf16, #tpu.memory_space<vmem>>, %arg2: memref<64x160xbf16, #tpu.memory_space<vmem>>, %arg3: memref<64x160xbf16, #tpu.memory_space<vmem>>, %arg4: memref<32x128xbf16, #tpu.memory_space<vmem>>, %arg5: memref<32x128xbf16, #tpu.memory_space<vmem>>, %arg6: memref<160x128xbf16, #tpu.memory_space<vmem>>, %arg7: memref<160x128xbf16, #tpu.memory_space<vmem>>, %arg8: memref<160x128xbf16, #tpu.memory_space<vmem>>, %arg9: memref<160x128xbf16, #tpu.memory_space<vmem>>, %arg10: memref<1x128xf32, #tpu.memory_space<vmem>>, %arg11: memref<64x128xf32, #tpu.memory_space<vmem>>) attributes {dimension_semantics = [#tpu.dimension_semantics<parallel>], iteration_bounds = array<i64: 1>, scalar_prefetch = 0 : i64, scratch_operands = 0 : i64, tpu.core_type = #tpu.core_type<tc>, window_params = [{transform_indices = @transform_0, window_bounds = array<i64: 64, 32>}, {transform_indices = @transform_1, window_bounds = array<i64: 64, 160>}, {transform_indices = @transform_2, window_bounds = array<i64: 64, 160>}, {pipeline_mode = #tpu.pipeline_mode<synchronous>, transform_indices = @transform_3, window_bounds = array<i64: 32, 128>}, {pipeline_mode = #tpu.pipeline_mode<synchronous>, transform_indices = @transform_4, window_bounds = array<i64: 32, 128>}, {pipeline_mode = #tpu.pipeline_mode<synchronous>, transform_indices = @transform_5, window_bounds = array<i64: 160, 128>}, {pipeline_mode = #tpu.pipeline_mode<synchronous>, transform_indices = @transform_6, window_bounds = array<i64: 160, 128>}, {pipeline_mode = #tpu.pipeline_mode<synchronous>, transform_indices = @transform_7, window_bounds = array<i64: 160, 128>}, {pipeline_mode = #tpu.pipeline_mode<synchronous>, transform_indices = @transform_8, window_bounds = array<i64: 160, 128>}, {pipeline_mode = #tpu.pipeline_mode<synchronous>, transform_indices = @transform_9, window_bounds = array<i64: 1, 128>}, {transform_indices = @transform_10, window_bounds = array<i64: 64, 128>}]} {
    %c0 = arith.constant 0 : index
    %c0_0 = arith.constant 0 : index
    %0 = vector.load %arg1[%c0, %c0_0] : memref<64x32xbf16, #tpu.memory_space<vmem>>, vector<64x32xbf16>
    %c0_1 = arith.constant 0 : index
    %c0_2 = arith.constant 0 : index
    %1 = vector.load %arg2[%c0_1, %c0_2] : memref<64x160xbf16, #tpu.memory_space<vmem>>, vector<64x160xbf16>
    %c0_3 = arith.constant 0 : index
    %c0_4 = arith.constant 0 : index
    %2 = vector.load %arg3[%c0_3, %c0_4] : memref<64x160xbf16, #tpu.memory_space<vmem>>, vector<64x160xbf16>
    %c0_5 = arith.constant 0 : index
    %c0_6 = arith.constant 0 : index
    %3 = vector.load %arg4[%c0_5, %c0_6] : memref<32x128xbf16, #tpu.memory_space<vmem>>, vector<32x128xbf16>
    %cst = arith.constant dense<0.000000e+00> : vector<64x128xf32>
    %4 = tpu.matmul %0, %3, %cst {dimension_numbers = #tpu.dot_dimension_numbers<[1], [0], [0], [1], [0, 0, 1, 1], [], []>} : vector<64x32xbf16>, vector<32x128xbf16>, vector<64x128xf32> -> vector<64x128xf32>
    %c0_7 = arith.constant 0 : index
    %c0_8 = arith.constant 0 : index
    %5 = vector.load %arg5[%c0_7, %c0_8] : memref<32x128xbf16, #tpu.memory_space<vmem>>, vector<32x128xbf16>
    %cst_9 = arith.constant dense<0.000000e+00> : vector<64x128xf32>
    %6 = tpu.matmul %0, %5, %cst_9 {dimension_numbers = #tpu.dot_dimension_numbers<[1], [0], [0], [1], [0, 0, 1, 1], [], []>} : vector<64x32xbf16>, vector<32x128xbf16>, vector<64x128xf32> -> vector<64x128xf32>
    %7 = arith.addf %4, %6 : vector<64x128xf32>
    %c0_10 = arith.constant 0 : index
    %c0_11 = arith.constant 0 : index
    %8 = vector.load %arg6[%c0_10, %c0_11] : memref<160x128xbf16, #tpu.memory_space<vmem>>, vector<160x128xbf16>
    %cst_12 = arith.constant dense<0.000000e+00> : vector<64x128xf32>
    %9 = tpu.matmul %1, %8, %cst_12 {dimension_numbers = #tpu.dot_dimension_numbers<[1], [0], [0], [1], [0, 0, 1, 1], [], []>} : vector<64x160xbf16>, vector<160x128xbf16>, vector<64x128xf32> -> vector<64x128xf32>
    %10 = arith.addf %7, %9 : vector<64x128xf32>
    %c0_13 = arith.constant 0 : index
    %c0_14 = arith.constant 0 : index
    %11 = vector.load %arg7[%c0_13, %c0_14] : memref<160x128xbf16, #tpu.memory_space<vmem>>, vector<160x128xbf16>
    %cst_15 = arith.constant dense<0.000000e+00> : vector<64x128xf32>
    %12 = tpu.matmul %1, %11, %cst_15 {dimension_numbers = #tpu.dot_dimension_numbers<[1], [0], [0], [1], [0, 0, 1, 1], [], []>} : vector<64x160xbf16>, vector<160x128xbf16>, vector<64x128xf32> -> vector<64x128xf32>
    %13 = arith.addf %10, %12 : vector<64x128xf32>
    %c0_16 = arith.constant 0 : index
    %c0_17 = arith.constant 0 : index
    %14 = vector.load %arg8[%c0_16, %c0_17] : memref<160x128xbf16, #tpu.memory_space<vmem>>, vector<160x128xbf16>
    %cst_18 = arith.constant dense<0.000000e+00> : vector<64x128xf32>
    %15 = tpu.matmul %2, %14, %cst_18 {dimension_numbers = #tpu.dot_dimension_numbers<[1], [0], [0], [1], [0, 0, 1, 1], [], []>} : vector<64x160xbf16>, vector<160x128xbf16>, vector<64x128xf32> -> vector<64x128xf32>
    %16 = arith.addf %13, %15 : vector<64x128xf32>
    %c0_19 = arith.constant 0 : index
    %c0_20 = arith.constant 0 : index
    %17 = vector.load %arg9[%c0_19, %c0_20] : memref<160x128xbf16, #tpu.memory_space<vmem>>, vector<160x128xbf16>
    %cst_21 = arith.constant dense<0.000000e+00> : vector<64x128xf32>
    %18 = tpu.matmul %2, %17, %cst_21 {dimension_numbers = #tpu.dot_dimension_numbers<[1], [0], [0], [1], [0, 0, 1, 1], [], []>} : vector<64x160xbf16>, vector<160x128xbf16>, vector<64x128xf32> -> vector<64x128xf32>
    %19 = arith.addf %16, %18 : vector<64x128xf32>
    %c0_22 = arith.constant 0 : index
    %c0_23 = arith.constant 0 : index
    %20 = vector.load %arg10[%c0_22, %c0_23] : memref<1x128xf32, #tpu.memory_space<vmem>>, vector<1x128xf32>
    %21 = vector.broadcast %20 : vector<1x128xf32> to vector<64x128xf32>
    %22 = arith.addf %19, %21 : vector<64x128xf32>
    %c0_24 = arith.constant 0 : index
    %c0_25 = arith.constant 0 : index
    %23 = vector.load %arg11[%c0_24, %c0_25] : memref<64x128xf32, #tpu.memory_space<vmem>>, vector<64x128xf32>
    tpu.vector_store %arg11[%c0_24, %c0_25], %22 {strides = array<i32>} : memref<64x128xf32, #tpu.memory_space<vmem>>, vector<64x128xf32>,
    return
  }
  func.func @transform_0(%arg0: i32) -> (i32, i32) {
    %c0_i32 = arith.constant 0 : i32
    %c0_i32_0 = arith.constant 0 : i32
    return %arg0, %c0_i32 : i32, i32
  }
  func.func @transform_1(%arg0: i32) -> (i32, i32) {
    %c0_i32 = arith.constant 0 : i32
    %c0_i32_0 = arith.constant 0 : i32
    return %arg0, %c0_i32 : i32, i32
  }
  func.func @transform_2(%arg0: i32) -> (i32, i32) {
    %c0_i32 = arith.constant 0 : i32
    %c0_i32_0 = arith.constant 0 : i32
    return %arg0, %c0_i32 : i32, i32
  }
  func.func @transform_3(%arg0: i32) -> (i32, i32) {
    %c0_i32 = arith.constant 0 : i32
    %c0_i32_0 = arith.constant 0 : i32
    %c0_i32_1 = arith.constant 0 : i32
    return %c0_i32, %c0_i32_0 : i32, i32
  }
  func.func @transform_4(%arg0: i32) -> (i32, i32) {
    %c0_i32 = arith.constant 0 : i32
    %c0_i32_0 = arith.constant 0 : i32
    %c0_i32_1 = arith.constant 0 : i32
    return %c0_i32, %c0_i32_0 : i32, i32
  }
  func.func @transform_5(%arg0: i32) -> (i32, i32) {
    %c0_i32 = arith.constant 0 : i32
    %c0_i32_0 = arith.constant 0 : i32
    %c0_i32_1 = arith.constant 0 : i32
    return %c0_i32, %c0_i32_0 : i32, i32
  }
  func.func @transform_6(%arg0: i32) -> (i32, i32) {
    %c0_i32 = arith.constant 0 : i32
    %c0_i32_0 = arith.constant 0 : i32
    %c0_i32_1 = arith.constant 0 : i32
    return %c0_i32, %c0_i32_0 : i32, i32
  }
  func.func @transform_7(%arg0: i32) -> (i32, i32) {
    %c0_i32 = arith.constant 0 : i32
    %c0_i32_0 = arith.constant 0 : i32
    %c0_i32_1 = arith.constant 0 : i32
    return %c0_i32, %c0_i32_0 : i32, i32
  }
  func.func @transform_8(%arg0: i32) -> (i32, i32) {
    %c0_i32 = arith.constant 0 : i32
    %c0_i32_0 = arith.constant 0 : i32
    %c0_i32_1 = arith.constant 0 : i32
    return %c0_i32, %c0_i32_0 : i32, i32
  }
  func.func @transform_9(%arg0: i32) -> (i32, i32) {
    %c0_i32 = arith.constant 0 : i32
    %c0_i32_0 = arith.constant 0 : i32
    %c0_i32_1 = arith.constant 0 : i32
    return %c0_i32, %c0_i32_0 : i32, i32
  }
  func.func @transform_10(%arg0: i32) -> (i32, i32) {
    %c0_i32 = arith.constant 0 : i32
    %c0_i32_0 = arith.constant 0 : i32
    return %arg0, %c0_i32 : i32, i32
  }
}

</mosaic_0001>

<bundles_post_ra>
// kernel: forward.1
= control target key start
LH: loop header
LB: loop body
LE: loop exit
PB: predicated region body
PF: predicated region fallthrough
CT: control target
= control target key end

     0   :  { %vm100_vm0 = vcmask 261120   ;;  %v1196_v7 = vmov 0   ;;  %s1535_s4 = inlined_call_operand.vmem [shape: bf16[32,128], index: 4, kind: input, shape index: {}]   ;;  %s1536_s3 = inlined_call_operand.vmem [shape: bf16[32,128], index: 3, kind: input, shape index: {}]   ;;  %s1537_s0 = inlined_call_operand.vmem [shape: bf16[64,32], index: 0, kind: input, shape index: {}]   ;;  %s1538_s5 = inlined_call_operand.vmem [shape: bf16[160,128], index: 5, kind: input, shape index: {}]   ;;  %s1539_s6 = inlined_call_operand.vmem [shape: bf16[160,128], index: 6, kind: input, shape index: {}]   ;;  %s1540_s1 = inlined_call_operand.vmem [shape: bf16[64,160], index: 1, kind: input, shape index: {}]   ;;  %s1541_s7 = inlined_call_operand.vmem [shape: bf16[160,128], index: 7, kind: input, shape index: {}]   ;;  %s1542_s8 = inlined_call_operand.vmem [shape: bf16[160,128], index: 8, kind: input, shape index: {}]   ;;  %s1543_s2 = inlined_call_operand.vmem [shape: bf16[64,160], index: 2, kind: input, shape index: {}]   ;;  %s1544_s9 = inlined_call_operand.vmem [shape: f32[1,128], index: 9, kind: input, shape index: {}]   ;;  %s1545_s10 = inlined_call_operand.vmem [shape: f32[64,128], index: 10, kind: output, shape index: {}]  }
   0x1   :  { %v1124_v0 = vld [vmem:[%s1535_s4] sm:$0xff]   ;;  %v1126_v2 = vld [vmem:[%s1535_s4 + $0x8] sm:$0xff]   ;;  %v1134_v11 = vld [vmem:[%s1538_s5 + $0x10] sm:$0xff]  }
   0x2   :  { %v1125_v1 = vld [vmem:[%s1536_s3] sm:$0xff]   ;;  %1091 = vmatprep.subr.bf16.mxu1 %v1124_v0  ;;  %v1127_v3 = vld [vmem:[%s1536_s3 + $0x8] sm:$0xff]   ;;  %v1135_v12 = vld [vmem:[%s1539_s6 + $0x10] sm:$0xff]  }
   0x3   :  { %1103 = vmatprep.subr.bf16.mxu0 %v1125_v1  ;;  %1092 = vmatpush3.bf16.msra.mxu1 %v1124_v0  ;;  %v1128_v4 = vld [vmem:[%s1537_s0] sm:$0xff]   ;;  %v1129_v5 = vld [vmem:[%s1537_s0 + $0x8] sm:$0xff]   ;;  %v1136_v13 = vld [vmem:[%s1538_s5 + $0x18] sm:$0xff]  }
   0x4   :  { %1104 = vmatpush3.bf16.msra.mxu0 %v1125_v1  ;;  %1093 = vmatprep.subr.bf16.mxu1 %v1126_v2  ;;  %v1130_v6 = vld [vmem:[%s1538_s5] sm:$0xff]   ;;  %v1132_v9 = vld [vmem:[%s1538_s5 + $0x8] sm:$0xff]   ;;  %v1137_v14 = vld [vmem:[%s1539_s6 + $0x18] sm:$0xff]  }
   0x5   :  { %1105 = vmatprep.subr.bf16.mxu0 %v1127_v3  ;;  %1095 = vmatprep.mubr.msk.bf16.mxu1 %vm100_vm0, %v1128_v4  ;;  %v1131_v8 = vld [vmem:[%s1539_s6] sm:$0xff]   ;;  %v1133_v10 = vld [vmem:[%s1539_s6 + $0x8] sm:$0xff]   ;;  %v1144_v15 = vld [vmem:[%s1537_s0 + $0x10] sm:$0xff]  }
   0x6   :  { %1107 = vmatprep.mubr.msk.bf16.mxu0 %vm100_vm0, %v1128_v4  ;;  %v1138_v16 = vld [vmem:[%s1538_s5 + $0x20] sm:$0xff]   ;;  %v1147_v17 = vld [vmem:[%s1537_s0 + $0x18] sm:$0xff]   ;;  %v1140_v19 = vld [vmem:[%s1538_s5 + $0x28] sm:$0xff]  }
   0x7   :  { %1094 = vmatpush3.bf16.msra.mxu1 %v1126_v2  ;;  %v1139_v18 = vld [vmem:[%s1539_s6 + $0x20] sm:$0xff]   ;;  %v1141_v20 = vld [vmem:[%s1539_s6 + $0x28] sm:$0xff]   ;;  %v1142_v22 = vld [vmem:[%s1538_s5 + $0x30] sm:$0xff]  }
   0x8   :  { %1106 = vmatpush3.bf16.msra.mxu0 %v1127_v3  ;;  %383 = vmatprep.subr.bf16.mxu1 %v1196_v7  ;;  %v1154_v21 = vld [vmem:[%s1540_s1 + $0x4] ss:$8 sps:$4 sm:$0xff]   ;;  %v1143_v23 = vld [vmem:[%s1539_s6 + $0x30] sm:$0xff]   ;;  %v1145_v24 = vld [vmem:[%s1538_s5 + $0x38] sm:$0xff]  }
   0x9   :  { %536 = vmatprep.subr.bf16.mxu0 %v1196_v7  ;;  %v1146_v25 = vld [vmem:[%s1539_s6 + $0x38] sm:$0xff]   ;;  %v1148_v26 = vld [vmem:[%s1538_s5 + $0x40] sm:$0xff]   ;;  %v1150_v28 = vld [vmem:[%s1538_s5 + $0x48] sm:$0xff]  }
   0xa   :  { %1096 = vmatmul.mubr.msk.bf16.vlgmr.msra.gmra.mrb[0].mxu1 %vm100_vm0, %v1129_v5  ;;  %v1149_v27 = vld [vmem:[%s1539_s6 + $0x40] sm:$0xff]   ;;  %v1151_v29 = vld [vmem:[%s1539_s6 + $0x48] sm:$0xff]   ;;  %v1159_v33 = vld [vmem:[%s1540_s1 + $0x14] ss:$8 sps:$4 sm:$0xff]  }
   0xb   :  { %1108 = vmatmul.mubr.msk.bf16.vlgmr.msra.gmra.mrb[0].mxu0 %vm100_vm0, %v1129_v5  ;;  %384 = vmatpush1.bf16.msra.mxu1 %v1130_v6  ;;  %v1152_v30 = vld [vmem:[%s1540_s1] ss:$8 sps:$4 sm:$0xff]   ;;  %v1161_v36 = vld [vmem:[%s1540_s1 + $0x10] ss:$8 sps:$4 sm:$0xff]   ;;  %v1166_v39 = vld [vmem:[%s1540_s1 + $0x24] ss:$8 sps:$4 sm:$0xff]  }
   0xc   :  { %537 = vmatpush1.bf16.msra.mxu0 %v1131_v8  ;;  %385 = vmatprep.subr.bf16.mxu1 %v1196_v7  ;;  %v1155_v31 = vld [vmem:[%s1541_s7] sm:$0xff]   ;;  %v1157_v34 = vld [vmem:[%s1541_s7 + $0x8] sm:$0xff]   ;;  %v1162_v37 = vld [vmem:[%s1541_s7 + $0x10] sm:$0xff]  }
   0xd   :  { %538 = vmatprep.subr.bf16.mxu0 %v1196_v7  ;;  %1099 = vmatprep.mubr.msk.bf16.mxu1 %vm100_vm0, %v1144_v15  ;;  %v1156_v32 = vld [vmem:[%s1542_s8] sm:$0xff]   ;;  %v1158_v35 = vld [vmem:[%s1542_s8 + $0x8] sm:$0xff]   ;;  %v1163_v38 = vld [vmem:[%s1542_s8 + $0x10] sm:$0xff]  }
   0xe   :  { %1111 = vmatprep.mubr.msk.bf16.mxu0 %vm100_vm0, %v1144_v15  ;;  %v1164_v40 = vld [vmem:[%s1541_s7 + $0x18] sm:$0xff]   ;;  %v1168_v42 = vld [vmem:[%s1540_s1 + $0x20] ss:$8 sps:$4 sm:$0xff]   ;;  %v1176_v49 = vld [vmem:[%s1541_s7 + $0x30] sm:$0xff]  }
   0xf   :  { %386 = vmatpush1.bf16.msra.mxu1 %v1132_v9  ;;  %v1165_v41 = vld [vmem:[%s1542_s8 + $0x18] sm:$0xff]   ;;  %v1169_v43 = vld [vmem:[%s1541_s7 + $0x20] sm:$0xff]   ;;  %v1171_v46 = vld [vmem:[%s1541_s7 + $0x28] sm:$0xff]  }
  0x10   :  { %539 = vmatpush1.bf16.msra.mxu0 %v1133_v10  ;;  %387 = vmatprep.subr.bf16.mxu1 %v1196_v7  ;;  %v1170_v44 = vld [vmem:[%s1542_s8 + $0x20] sm:$0xff]   ;;  %v1173_v45 = vld [vmem:[%s1540_s1 + $0x34] ss:$8 sps:$4 sm:$0xff]   ;;  %v1172_v47 = vld [vmem:[%s1542_s8 + $0x28] sm:$0xff]  }
  0x11   :  { %540 = vmatprep.subr.bf16.mxu0 %v1196_v7  ;;  %v1175_v48 = vld [vmem:[%s1540_s1 + $0x30] ss:$8 sps:$4 sm:$0xff]   ;;  %v1186_v51 = vld [vmem:[%s1543_s2 + $0x4] ss:$8 sps:$4 sm:$0xff]   ;;  %v1184_v58 = vld [vmem:[%s1543_s2] ss:$8 sps:$4 sm:$0xff]  }
  0x12   :  { %1100 = vmatmul.mubr.msk.bf16.gmra.mrb[4].mxu1 %vm100_vm0, %v1147_v17  ;;  %v1177_v50 = vld [vmem:[%s1542_s8 + $0x30] sm:$0xff]   ;;  %v1178_v52 = vld [vmem:[%s1541_s7 + $0x38] sm:$0xff]   ;;  %v1180_v54 = vld [vmem:[%s1541_s7 + $0x40] sm:$0xff]  }
  0x13   :  { %388 = vmatpush1.bf16.msra.mxu1 %v1134_v11  ;;  %1112 = vmatmul.mubr.msk.bf16.gmra.mrb[4].mxu0 %vm100_vm0, %v1147_v17  ;;  %v1179_v53 = vld [vmem:[%s1542_s8 + $0x38] sm:$0xff]   ;;  %v1181_v55 = vld [vmem:[%s1542_s8 + $0x40] sm:$0xff]   ;;  %v1182_v56 = vld [vmem:[%s1541_s7 + $0x48] sm:$0xff]  }
  0x14   :  { %541 = vmatpush1.bf16.msra.mxu0 %v1135_v12  ;;  %389 = vmatprep.subr.bf16.mxu1 %v1196_v7  ;;  %v1183_v57 = vld [vmem:[%s1542_s8 + $0x48] sm:$0xff]   ;;  %v1187_v59 = vld [vmem:[%s1543_s2 + $0x14] ss:$8 sps:$4 sm:$0xff]   ;;  %v1189_v60 = vld [vmem:[%s1543_s2 + $0x10] ss:$8 sps:$4 sm:$0xff]  }
  0x15   :  { %542 = vmatprep.subr.bf16.mxu0 %v1196_v7  ;;  %1024 = vmatprep.mubr.msk.bf16.mxu1 %vm100_vm0, %v1154_v21  ;;  %v1190_v61 = vld [vmem:[%s1543_s2 + $0x24] ss:$8 sps:$4 sm:$0xff]   ;;  %v1192_v62 = vld [vmem:[%s1543_s2 + $0x20] ss:$8 sps:$4 sm:$0xff]   ;;  %v1193_v63 = vld [vmem:[%s1543_s2 + $0x34] ss:$8 sps:$4 sm:$0xff]  }
  0x16   :  { %1038 = vmatprep.mubr.msk.bf16.mxu0 %vm100_vm0, %v1154_v21  ;;  %v1195_v0 = vld [vmem:[%s1543_s2 + $0x30] ss:$8 sps:$4 sm:$0xff]  }
  0x17   :  { %390 = vmatpush1.bf16.msra.mxu1 %v1136_v13 }
  0x18   :  { %543 = vmatpush1.bf16.msra.mxu0 %v1137_v14  ;;  %391 = vmatprep.subr.bf16.mxu1 %v1196_v7 }
  0x19   :  { %544 = vmatprep.subr.bf16.mxu0 %v1196_v7 }
  0x1b   :  { %392 = vmatpush1.bf16.msra.mxu1 %v1138_v16 }
  0x1c   :  { %545 = vmatpush1.bf16.msra.mxu0 %v1139_v18  ;;  %393 = vmatprep.subr.bf16.mxu1 %v1196_v7 }
  0x1d   :  { %546 = vmatprep.subr.bf16.mxu0 %v1196_v7 }
  0x1f   :  { %394 = vmatpush1.bf16.msra.mxu1 %v1140_v19 }
  0x20   :  { %547 = vmatpush1.bf16.msra.mxu0 %v1141_v20  ;;  %395 = vmatprep.subr.bf16.mxu1 %v1196_v7 }
  0x21   :  { %548 = vmatprep.subr.bf16.mxu0 %v1196_v7 }
  0x23   :  { %396 = vmatpush1.bf16.msra.mxu1 %v1142_v22 }
  0x24   :  { %549 = vmatpush1.bf16.msra.mxu0 %v1143_v23  ;;  %397 = vmatprep.subr.bf16.mxu1 %v1196_v7 }
  0x25   :  { %550 = vmatprep.subr.bf16.mxu0 %v1196_v7 }
  0x27   :  { %398 = vmatpush1.bf16.msra.mxu1 %v1145_v24 }
  0x28   :  { %551 = vmatpush1.bf16.msra.mxu0 %v1146_v25  ;;  %399 = vmatprep.subr.bf16.mxu1 %v1196_v7 }
  0x29   :  { %552 = vmatprep.subr.bf16.mxu0 %v1196_v7 }
  0x2b   :  { %400 = vmatpush1.bf16.msra.mxu1 %v1148_v26 }
  0x2c   :  { %553 = vmatpush1.bf16.msra.mxu0 %v1149_v27  ;;  %401 = vmatprep.subr.bf16.mxu1 %v1196_v7 }
  0x2d   :  { %554 = vmatprep.subr.bf16.mxu0 %v1196_v7 }
  0x2f   :  { %402 = vmatpush1.bf16.msra.mxu1 %v1150_v28 }
  0x30   :  { %555 = vmatpush1.bf16.msra.mxu0 %v1151_v29  ;;  %737 = vmatprep.subr.bf16.mxu1 %v1196_v7 }
  0x31   :  { %890 = vmatprep.subr.bf16.mxu0 %v1196_v7 }
  0x32   :  { %416 = vmatmul.mubr.bf16.vlgmr.msra.gmra.mrb[8].mxu1 %v1152_v30 }
  0x33   :  { %569 = vmatmul.mubr.bf16.vlgmr.msra.gmra.mrb[8].mxu0 %v1152_v30  ;;  %738 = vmatpush1.bf16.msra.mxu1 %v1155_v31 }
  0x34   :  { %891 = vmatpush1.bf16.msra.mxu0 %v1156_v32  ;;  %739 = vmatprep.subr.bf16.mxu1 %v1196_v7 }
  0x35   :  { %892 = vmatprep.subr.bf16.mxu0 %v1196_v7  ;;  %1025 = vmatprep.mubr.msk.bf16.mxu1 %vm100_vm0, %v1159_v33 }
  0x36   :  { %1039 = vmatprep.mubr.msk.bf16.mxu0 %vm100_vm0, %v1159_v33 }
  0x37   :  { %740 = vmatpush1.bf16.msra.mxu1 %v1157_v34 }
  0x38   :  { %893 = vmatpush1.bf16.msra.mxu0 %v1158_v35  ;;  %741 = vmatprep.subr.bf16.mxu1 %v1196_v7 }
  0x39   :  { %894 = vmatprep.subr.bf16.mxu0 %v1196_v7 }
  0x3a   :  { %424 = vmatmul.mubr.bf16.gmra.mrb[12].mxu1 %v1161_v36 }
  0x3b   :  { %742 = vmatpush1.bf16.msra.mxu1 %v1162_v37  ;;  %577 = vmatmul.mubr.bf16.gmra.mrb[12].mxu0 %v1161_v36 }
  0x3c   :  { %895 = vmatpush1.bf16.msra.mxu0 %v1163_v38  ;;  %743 = vmatprep.subr.bf16.mxu1 %v1196_v7 }
  0x3d   :  { %896 = vmatprep.subr.bf16.mxu0 %v1196_v7  ;;  %1026 = vmatprep.mubr.msk.bf16.mxu1 %vm100_vm0, %v1166_v39 }
  0x3e   :  { %1040 = vmatprep.mubr.msk.bf16.mxu0 %vm100_vm0, %v1166_v39 }
  0x3f   :  { %744 = vmatpush1.bf16.msra.mxu1 %v1164_v40 }
  0x40   :  { %897 = vmatpush1.bf16.msra.mxu0 %v1165_v41  ;;  %745 = vmatprep.subr.bf16.mxu1 %v1196_v7 }
  0x41   :  { %898 = vmatprep.subr.bf16.mxu0 %v1196_v7 }
  0x42   :  { %432 = vmatmul.mubr.bf16.gmra.mrb[16].mxu1 %v1168_v42 }
  0x43   :  { %746 = vmatpush1.bf16.msra.mxu1 %v1169_v43  ;;  %585 = vmatmul.mubr.bf16.gmra.mrb[16].mxu0 %v1168_v42 }
  0x44   :  { %899 = vmatpush1.bf16.msra.mxu0 %v1170_v44  ;;  %747 = vmatprep.subr.bf16.mxu1 %v1196_v7 }
  0x45   :  { %900 = vmatprep.subr.bf16.mxu0 %v1196_v7  ;;  %1027 = vmatprep.mubr.msk.bf16.mxu1 %vm100_vm0, %v1173_v45 }
  0x46   :  { %1041 = vmatprep.mubr.msk.bf16.mxu0 %vm100_vm0, %v1173_v45 }
  0x47   :  { %748 = vmatpush1.bf16.msra.mxu1 %v1171_v46 }
  0x48   :  { %901 = vmatpush1.bf16.msra.mxu0 %v1172_v47  ;;  %749 = vmatprep.subr.bf16.mxu1 %v1196_v7 }
  0x49   :  { %902 = vmatprep.subr.bf16.mxu0 %v1196_v7 }
  0x4a   :  { %440 = vmatmul.mubr.bf16.gmra.mrb[20].mxu1 %v1175_v48 }
  0x4b   :  { %750 = vmatpush1.bf16.msra.mxu1 %v1176_v49  ;;  %593 = vmatmul.mubr.bf16.gmra.mrb[20].mxu0 %v1175_v48 }
  0x4c   :  { %903 = vmatpush1.bf16.msra.mxu0 %v1177_v50  ;;  %751 = vmatprep.subr.bf16.mxu1 %v1196_v7 }
  0x4d   :  { %904 = vmatprep.subr.bf16.mxu0 %v1196_v7  ;;  %1060 = vmatprep.mubr.msk.bf16.mxu1 %vm100_vm0, %v1186_v51 }
  0x4e   :  { %1074 = vmatprep.mubr.msk.bf16.mxu0 %vm100_vm0, %v1186_v51 }
  0x4f   :  { %752 = vmatpush1.bf16.msra.mxu1 %v1178_v52 }
  0x50   :  { %905 = vmatpush1.bf16.msra.mxu0 %v1179_v53  ;;  %753 = vmatprep.subr.bf16.mxu1 %v1196_v7 }
  0x51   :  { %906 = vmatprep.subr.bf16.mxu0 %v1196_v7 }
  0x53   :  { %754 = vmatpush1.bf16.msra.mxu1 %v1180_v54 }
  0x54   :  { %907 = vmatpush1.bf16.msra.mxu0 %v1181_v55  ;;  %755 = vmatprep.subr.bf16.mxu1 %v1196_v7 }
  0x55   :  { %908 = vmatprep.subr.bf16.mxu0 %v1196_v7 }
  0x57   :  { %756 = vmatpush1.bf16.msra.mxu1 %v1182_v56 }
  0x58   :  { %909 = vmatpush1.bf16.msra.mxu0 %v1183_v57 }
  0x5a   :  { %770 = vmatmul.mubr.bf16.vlgmr.msra.gmra.mrb[24].mxu1 %v1184_v58 }
  0x5b   :  { %923 = vmatmul.mubr.bf16.vlgmr.msra.gmra.mrb[24].mxu0 %v1184_v58  ;;  %1061 = vmatprep.mubr.msk.bf16.mxu1 %vm100_vm0, %v1187_v59 }
  0x5c   :  { %1075 = vmatprep.mubr.msk.bf16.mxu0 %vm100_vm0, %v1187_v59 }
  0x62   :  { %778 = vmatmul.mubr.bf16.gmra.mrb[28].mxu1 %v1189_v60 }
  0x63   :  { %931 = vmatmul.mubr.bf16.gmra.mrb[28].mxu0 %v1189_v60  ;;  %1062 = vmatprep.mubr.msk.bf16.mxu1 %vm100_vm0, %v1190_v61 }
  0x64   :  { %1076 = vmatprep.mubr.msk.bf16.mxu0 %vm100_vm0, %v1190_v61 }
  0x6a   :  { %786 = vmatmul.mubr.bf16.gmra.mrb[32].mxu1 %v1192_v62 }
  0x6b   :  { %939 = vmatmul.mubr.bf16.gmra.mrb[32].mxu0 %v1192_v62  ;;  %1063 = vmatprep.mubr.msk.bf16.mxu1 %vm100_vm0, %v1193_v63 }
  0x6c   :  { %1077 = vmatprep.mubr.msk.bf16.mxu0 %vm100_vm0, %v1193_v63 }
  0x72   :  { %794 = vmatmul.mubr.bf16.gmra.mrb[36].mxu1 %v1195_v0 }
  0x73   :  { %947 = vmatmul.mubr.bf16.gmra.mrb[36].mxu0 %v1195_v0 }
  0xdd   :  { %v1097_v1 = vpop.f32.mrb[0].mxu1 }
  0xde   :  { %v1109_v2 = vpop.f32.mrb[0].mxu0  ;;  %v147_v3 = vpop.f32.mrb[1].mxu1 }
  0xdf   :  { %v233_v4 = vadd.f32 %v1109_v2, %v1097_v1  ;;  %v224_v5 = vpop.f32.mrb[1].mxu0  ;;  %v1098_v6 = vpop.f32.mrb[2].mxu1 }
  0xe0   :  { %v225_v7 = vadd.f32 %v224_v5, %v147_v3  ;;  %v1110_v8 = vpop.f32.mrb[2].mxu0  ;;  %v150_v9 = vpop.f32.mrb[3].mxu1 }
  0xe1   :  { %v236_v10 = vadd.f32 %v1110_v8, %v1098_v6  ;;  %v227_v11 = vpop.f32.mrb[3].mxu0 }
  0xe2   :  { %v228_v12 = vadd.f32 %v227_v11, %v150_v9 }
  0xe5   :  { %v1101_v13 = vpop.f32.mrb[4].mxu1 }
  0xe6   :  { %v1113_v14 = vpop.f32.mrb[4].mxu0  ;;  %v163_v15 = vpop.f32.mrb[5].mxu1 }
  0xe7   :  { %v249_v16 = vadd.f32 %v1113_v14, %v1101_v13  ;;  %v240_v17 = vpop.f32.mrb[5].mxu0  ;;  %v1102_v18 = vpop.f32.mrb[6].mxu1  ;;  %v1078_v13 = vld [vmem:[%s1544_s9] ss:$0 sm:$0xff] }
  0xe8   :  { %v241_v19 = vadd.f32 %v240_v17, %v163_v15  ;;  %v1114_v20 = vpop.f32.mrb[6].mxu0  ;;  %v166_v21 = vpop.f32.mrb[7].mxu1 }
  0xe9   :  { %v252_v22 = vadd.f32 %v1114_v20, %v1102_v18  ;;  %v243_v23 = vpop.f32.mrb[7].mxu0 }
  0xea   :  { %v244_v24 = vadd.f32 %v243_v23, %v166_v21 }
 0x105   :  { %v417_v25 = vpop.f32.mrb[8].mxu1 }
 0x106   :  { %v448_v26 = vadd.f32 %v417_v25, %v225_v7  ;;  %v570_v27 = vpop.f32.mrb[8].mxu0  ;;  %v419_v28 = vpop.f32.mrb[9].mxu1 }
 0x107   :  { %v572_v29 = vpop.f32.mrb[9].mxu0  ;;  %v420_v30 = vpop.f32.mrb[10].mxu1 }
 0x108   :  { %v601_v31 = vadd.f32 %v570_v27, %v448_v26  ;;  %v449_v32 = vadd.f32 %v420_v30, %v228_v12  ;;  %v573_v33 = vpop.f32.mrb[10].mxu0  ;;  %v422_v34 = vpop.f32.mrb[11].mxu1 }
 0x109   :  { %v575_v35 = vpop.f32.mrb[11].mxu0 }
 0x10a   :  { %v602_v36 = vadd.f32 %v573_v33, %v449_v32 }
 0x10d   :  { %v425_v37 = vpop.f32.mrb[12].mxu1 }
 0x10e   :  { %v450_v38 = vadd.f32 %v425_v37, %v233_v4  ;;  %v427_v39 = vpop.f32.mrb[13].mxu1  ;;  %v578_v40 = vpop.f32.mrb[12].mxu0 }
 0x10f   :  { %v428_v41 = vpop.f32.mrb[14].mxu1  ;;  %v580_v42 = vpop.f32.mrb[13].mxu0 }
 0x110   :  { %v451_v43 = vadd.f32 %v428_v41, %v236_v10  ;;  %v603_v44 = vadd.f32 %v578_v40, %v450_v38  ;;  %v581_v45 = vpop.f32.mrb[14].mxu0  ;;  %v430_v46 = vpop.f32.mrb[15].mxu1 }
 0x111   :  { %v583_v47 = vpop.f32.mrb[15].mxu0 }
 0x112   :  { %v604_v48 = vadd.f32 %v581_v45, %v451_v43 }
 0x115   :  { %v433_v49 = vpop.f32.mrb[16].mxu1 }
 0x116   :  { %v452_v50 = vadd.f32 %v433_v49, %v241_v19  ;;  %v435_v51 = vpop.f32.mrb[17].mxu1  ;;  %v586_v52 = vpop.f32.mrb[16].mxu0 }
 0x117   :  { %v436_v53 = vpop.f32.mrb[18].mxu1  ;;  %v588_v54 = vpop.f32.mrb[17].mxu0 }
 0x118   :  { %v453_v55 = vadd.f32 %v436_v53, %v244_v24  ;;  %v605_v56 = vadd.f32 %v586_v52, %v452_v50  ;;  %v589_v57 = vpop.f32.mrb[18].mxu0  ;;  %v438_v58 = vpop.f32.mrb[19].mxu1 }
 0x119   :  { %v591_v59 = vpop.f32.mrb[19].mxu0 }
 0x11a   :  { %v606_v60 = vadd.f32 %v589_v57, %v453_v55 }
 0x11d   :  { %v441_v61 = vpop.f32.mrb[20].mxu1 }
 0x11e   :  { %v454_v62 = vadd.f32 %v441_v61, %v249_v16  ;;  %v443_v63 = vpop.f32.mrb[21].mxu1  ;;  %v594_v0 = vpop.f32.mrb[20].mxu0 }
 0x11f   :  { %v444_v1 = vpop.f32.mrb[22].mxu1  ;;  %v596_v2 = vpop.f32.mrb[21].mxu0 }
 0x120   :  { %v455_v3 = vadd.f32 %v444_v1, %v252_v22  ;;  %v607_v4 = vadd.f32 %v594_v0, %v454_v62  ;;  %v597_v5 = vpop.f32.mrb[22].mxu0  ;;  %v446_v6 = vpop.f32.mrb[23].mxu1 }
 0x121   :  { %v599_v7 = vpop.f32.mrb[23].mxu0 }
 0x122   :  { %v608_v8 = vadd.f32 %v597_v5, %v455_v3 }
 0x12d   :  { %v771_v9 = vpop.f32.mrb[24].mxu1 }
 0x12e   :  { %v802_v10 = vadd.f32 %v771_v9, %v601_v31  ;;  %v924_v11 = vpop.f32.mrb[24].mxu0  ;;  %v773_v12 = vpop.f32.mrb[25].mxu1 }
 0x12f   :  { %v926_v14 = vpop.f32.mrb[25].mxu0  ;;  %v774_v15 = vpop.f32.mrb[26].mxu1 }
 0x130   :  { %v955_v16 = vadd.f32 %v924_v11, %v802_v10  ;;  %v803_v17 = vadd.f32 %v774_v15, %v602_v36  ;;  %v927_v18 = vpop.f32.mrb[26].mxu0  ;;  %v776_v19 = vpop.f32.mrb[27].mxu1 }
 0x131   :  { %v929_v20 = vpop.f32.mrb[27].mxu0 }
 0x132   :  { %v970_v21 = vadd.f32 %v1078_v13, %v955_v16  ;;  %v956_v22 = vadd.f32 %v927_v18, %v803_v17 }
 0x134   :  { %978 = vst [vmem:[%s1545_s10] sm:$0xff] %v970_v21  ;;  %v971_v23 = vadd.f32 %v1078_v13, %v956_v22 }
 0x135   :  { %v779_v24 = vpop.f32.mrb[28].mxu1 }
 0x136   :  { %979 = vst [vmem:[%s1545_s10 + $0x8] sm:$0xff] %v971_v23  ;;  %v804_v25 = vadd.f32 %v779_v24, %v603_v44  ;;  %v932_v26 = vpop.f32.mrb[28].mxu0  ;;  %v781_v27 = vpop.f32.mrb[29].mxu1 }
 0x137   :  { %v934_v28 = vpop.f32.mrb[29].mxu0  ;;  %v782_v29 = vpop.f32.mrb[30].mxu1 }
 0x138   :  { %v957_v30 = vadd.f32 %v932_v26, %v804_v25  ;;  %v805_v31 = vadd.f32 %v782_v29, %v604_v48  ;;  %v935_v32 = vpop.f32.mrb[30].mxu0  ;;  %v784_v33 = vpop.f32.mrb[31].mxu1 }
 0x139   :  { %v937_v34 = vpop.f32.mrb[31].mxu0 }
 0x13a   :  { %v972_v35 = vadd.f32 %v1078_v13, %v957_v30  ;;  %v958_v36 = vadd.f32 %v935_v32, %v805_v31 }
 0x13c   :  { %980 = vst [vmem:[%s1545_s10 + $0x10] sm:$0xff] %v972_v35  ;;  %v973_v37 = vadd.f32 %v1078_v13, %v958_v36 }
 0x13d   :  { %v787_v38 = vpop.f32.mrb[32].mxu1 }
 0x13e   :  { %981 = vst [vmem:[%s1545_s10 + $0x18] sm:$0xff] %v973_v37  ;;  %v806_v39 = vadd.f32 %v787_v38, %v605_v56  ;;  %v940_v40 = vpop.f32.mrb[32].mxu0  ;;  %v789_v41 = vpop.f32.mrb[33].mxu1 }
 0x13f   :  { %v942_v42 = vpop.f32.mrb[33].mxu0  ;;  %v790_v43 = vpop.f32.mrb[34].mxu1 }
 0x140   :  { %v959_v44 = vadd.f32 %v940_v40, %v806_v39  ;;  %v807_v45 = vadd.f32 %v790_v43, %v606_v60  ;;  %v943_v46 = vpop.f32.mrb[34].mxu0  ;;  %v792_v47 = vpop.f32.mrb[35].mxu1 }
 0x141   :  { %v945_v48 = vpop.f32.mrb[35].mxu0 }
 0x142   :  { %v974_v49 = vadd.f32 %v1078_v13, %v959_v44  ;;  %v960_v50 = vadd.f32 %v943_v46, %v807_v45 }
 0x144   :  { %982 = vst [vmem:[%s1545_s10 + $0x20] sm:$0xff] %v974_v49  ;;  %v975_v51 = vadd.f32 %v1078_v13, %v960_v50 }
 0x145   :  { %v795_v52 = vpop.f32.mrb[36].mxu1 }
 0x146   :  { %983 = vst [vmem:[%s1545_s10 + $0x28] sm:$0xff] %v975_v51  ;;  %v808_v53 = vadd.f32 %v795_v52, %v607_v4  ;;  %v948_v54 = vpop.f32.mrb[36].mxu0  ;;  %v797_v55 = vpop.f32.mrb[37].mxu1 }
 0x147   :  { %v950_v56 = vpop.f32.mrb[37].mxu0  ;;  %v798_v57 = vpop.f32.mrb[38].mxu1 }
 0x148   :  { %v961_v58 = vadd.f32 %v948_v54, %v808_v53  ;;  %v809_v59 = vadd.f32 %v798_v57, %v608_v8  ;;  %v951_v60 = vpop.f32.mrb[38].mxu0  ;;  %v800_v61 = vpop.f32.mrb[39].mxu1 }
 0x149   :  { %v953_v62 = vpop.f32.mrb[39].mxu0 }
 0x14a   :  { %v976_v63 = vadd.f32 %v1078_v13, %v961_v58  ;;  %v962_v0 = vadd.f32 %v951_v60, %v809_v59 }
 0x14c   :  { %984 = vst [vmem:[%s1545_s10 + $0x30] sm:$0xff] %v976_v63  ;;  %v977_v1 = vadd.f32 %v1078_v13, %v962_v0 }
 0x14e   :  { %985 = vst [vmem:[%s1545_s10 + $0x38] sm:$0xff] %v977_v1 }

</bundles_post_ra>
